<compile_context>
chip_gen: v7x
topology: tpu7x:2x2x1
jax: 0.10.0
libtpu: 0.0.40
codegen_flags: <defaults>
</compile_context>

<pallas_src>
import jax
import jax.numpy as jnp
from jax import lax
from jax.experimental import pallas as pl
from jax.experimental.pallas import tpu as pltpu

EMBED_SIZE = 256   # matches `embedding_dim = 256` in the PyTorch module
EPS = 1e-5         # nn.LayerNorm default eps


def add_norm_kernel(x_ref, y_ref, g_ref, b_ref, o_ref):
    # residual add, upcast to f32 for LayerNorm stats (matches PyTorch semantics)
    s = x_ref[...].astype(jnp.float32) + y_ref[...].astype(jnp.float32)
    # LayerNorm stats over the last (lane) axis: biased variance, eps inside rsqrt
    mean = jnp.mean(s, axis=-1, keepdims=True)
    c = s - mean
    var = jnp.mean(c * c, axis=-1, keepdims=True)
    inv = lax.rsqrt(var + EPS)
    # Fold the affine so the output pass reads `s` directly (drops `c` from the
    # live set): o = s*(inv*g) + (b - mean*inv*g)
    scale = inv * g_ref[...]            # (tile_rows,1)*(1,embed) broadcast
    shift = b_ref[...] - mean * scale
    o_ref[...] = (s * scale + shift).astype(o_ref.dtype)


def _round_up(n, m):
    return ((n + m - 1) // m) * m


def add_norm(x, sublayer_output, gamma, beta, *, tile_rows=None):
    """x, sublayer_output: (..., embed). gamma, beta: (embed,)."""
    assert x.shape == sublayer_output.shape
    embed = x.shape[-1]
    assert gamma.shape == (embed,) and beta.shape == (embed,)

    orig_shape = x.shape
    x2 = x.reshape(-1, embed)
    y2 = sublayer_output.reshape(-1, embed)
    rows = x2.shape[0]

    # HBM-bandwidth-bound op -> large lane-dense tiles, but keep enough grid
    # steps on big inputs that the "parallel" axis can shard across v7x's 2 TCs.
    # 16-row alignment covers f32 and bf16 sublane packing.
    if tile_rows is None:
        target = max(512, _round_up(pl.cdiv(rows, 4), 16))
        tile_rows = min(2048, target)
    tile_rows = max(16, _round_up(tile_rows, 16))
    tile_rows = min(tile_rows, _round_up(rows, 16))   # never larger than the input

    # Ragged final block: Pallas masks out-of-bounds writes; out-of-bounds reads
    # are don't-care and cannot leak into valid rows (per-row LayerNorm).
    grid_steps = pl.cdiv(rows, tile_rows)

    g2 = gamma.reshape(1, embed).astype(jnp.float32)
    b2 = beta.reshape(1, embed).astype(jnp.float32)

    itemsize = jnp.dtype(x.dtype).itemsize
    io_tile_bytes = tile_rows * embed * itemsize
    f32_tile_bytes = tile_rows * embed * 4
    # double-buffered x/y/out tiles + ~3 full-tile f32 intermediates (s, c,
    # output staging) + resident gamma/beta + slack.
    vmem_bytes = 2 * 3 * io_tile_bytes + 3 * f32_tile_bytes + 2 * embed * 4 + (2 << 20)

    cost = pl.CostEstimate(
        flops=8 * rows * embed,
        transcendentals=rows,                                  # one rsqrt per row
        bytes_accessed=3 * rows * embed * itemsize + 2 * embed * 4,
    )

    out = pl.pallas_call(
        add_norm_kernel,
        out_shape=jax.ShapeDtypeStruct((rows, embed), x.dtype),
        grid_spec=pltpu.PrefetchScalarGridSpec(
            num_scalar_prefetch=0,
            grid=(grid_steps,),
            in_specs=[
                pl.BlockSpec((tile_rows, embed), lambda i: (i, 0)),
                pl.BlockSpec((tile_rows, embed), lambda i: (i, 0)),
                pl.BlockSpec((1, embed), lambda i: (0, 0)),   # gamma: resident
                pl.BlockSpec((1, embed), lambda i: (0, 0)),   # beta: resident
            ],
            out_specs=pl.BlockSpec((tile_rows, embed), lambda i: (i, 0)),
        ),
        compiler_params=pltpu.CompilerParams(
            dimension_semantics=("parallel",),
            vmem_limit_bytes=int(vmem_bytes),
        ),
        cost_estimate=cost,
    )(x2, y2, g2, b2)

    return out.reshape(orig_shape)


def add_norm_ref(x, sublayer_output, gamma, beta):
    s = x.astype(jnp.float32) + sublayer_output.astype(jnp.float32)
    mean = jnp.mean(s, axis=-1, keepdims=True)
    var = jnp.mean((s - mean) ** 2, axis=-1, keepdims=True)
    return ((s - mean) * lax.rsqrt(var + EPS) * gamma + beta).astype(x.dtype)


if __name__ == "__main__":
    key = jax.random.PRNGKey(0)
    k1, k2, k3, k4 = jax.random.split(key, 4)

    # nn.LayerNorm default (elementwise_affine=True): weight=1, bias=0
    gamma = jnp.ones((EMBED_SIZE,), dtype=jnp.float32)
    beta = jnp.zeros((EMBED_SIZE,), dtype=jnp.float32)

    # --- main small f32 case (matches the module's usage) ---
    batch, seq = 2, 8
    x = jax.random.normal(k1, (batch, seq, EMBED_SIZE), dtype=jnp.float32)
    sub = jax.random.normal(k2, (batch, seq, EMBED_SIZE), dtype=jnp.float32)
    out = jax.block_until_ready(add_norm(x, sub, gamma, beta))
    ref = add_norm_ref(x, sub, gamma, beta)
    assert out.shape == (batch, seq, EMBED_SIZE)
    assert jnp.allclose(out, ref, atol=1e-5, rtol=1e-5)

    # --- odd row count (exercises the ragged final-block / masked-write path) ---
    x3 = jax.random.normal(k3, (3, 5, EMBED_SIZE), dtype=jnp.float32)
    s3 = jax.random.normal(k4, (3, 5, EMBED_SIZE), dtype=jnp.float32)
    out3 = jax.block_until_ready(add_norm(x3, s3, gamma, beta))
    ref3 = add_norm_ref(x3, s3, gamma, beta)
    assert out3.shape == (3, 5, EMBED_SIZE)
    assert jnp.allclose(out3, ref3, atol=1e-5, rtol=1e-5)
    assert jnp.all(jnp.isfinite(out3))

    # --- bf16 I/O path (halves HBM traffic; stats still f32 in-kernel) ---
    xb = x.astype(jnp.bfloat16)
    sb = sub.astype(jnp.bfloat16)
    outb = jax.block_until_ready(add_norm(xb, sb, gamma, beta))
    refb = add_norm_ref(xb, sb, gamma, beta)
    assert outb.dtype == jnp.bfloat16
    assert jnp.allclose(outb.astype(jnp.float32), refb.astype(jnp.float32),
                        atol=2e-2, rtol=2e-2)

    print("KERNEL_OK")
</pallas_src>

<mosaic_0001>
module attributes {stable_mosaic.version = 11 : i64} {
  func.func @add_norm_kernel(%arg0: i32, %arg1: memref<16x256xf32, #tpu.memory_space<vmem>>, %arg2: memref<16x256xf32, #tpu.memory_space<vmem>>, %arg3: memref<1x256xf32, #tpu.memory_space<vmem>>, %arg4: memref<1x256xf32, #tpu.memory_space<vmem>>, %arg5: memref<16x256xf32, #tpu.memory_space<vmem>>) attributes {dimension_semantics = [#tpu.dimension_semantics<parallel>], iteration_bounds = array<i64: 1>, scalar_prefetch = 0 : i64, scratch_operands = 0 : i64, tpu.core_type = #tpu.core_type<tc>, window_params = [{transform_indices = @transform_0, window_bounds = array<i64: 16, 256>}, {transform_indices = @transform_1, window_bounds = array<i64: 16, 256>}, {pipeline_mode = #tpu.pipeline_mode<synchronous>, transform_indices = @transform_2, window_bounds = array<i64: 1, 256>}, {pipeline_mode = #tpu.pipeline_mode<synchronous>, transform_indices = @transform_3, window_bounds = array<i64: 1, 256>}, {transform_indices = @transform_4, window_bounds = array<i64: 16, 256>}]} {
    %c0 = arith.constant 0 : index
    %c0_0 = arith.constant 0 : index
    %0 = vector.load %arg1[%c0, %c0_0] : memref<16x256xf32, #tpu.memory_space<vmem>>, vector<16x256xf32>
    %c0_1 = arith.constant 0 : index
    %c0_2 = arith.constant 0 : index
    %1 = vector.load %arg2[%c0_1, %c0_2] : memref<16x256xf32, #tpu.memory_space<vmem>>, vector<16x256xf32>
    %2 = arith.addf %0, %1 : vector<16x256xf32>
    %cst = arith.constant dense<0.000000e+00> : vector<16xf32>
    %3 = vector.multi_reduction <add>, %2, %cst [1] : vector<16x256xf32> to vector<16xf32>
    %4 = vector.shape_cast %3 : vector<16xf32> to vector<16x1xf32>
    %cst_3 = arith.constant 2.560000e+02 : f32
    %5 = vector.broadcast %cst_3 : f32 to vector<16x1xf32>
    %6 = arith.divf %4, %5 : vector<16x1xf32>
    %7 = vector.broadcast %6 : vector<16x1xf32> to vector<16x256xf32>
    %8 = arith.subf %2, %7 : vector<16x256xf32>
    %9 = arith.mulf %8, %8 : vector<16x256xf32>
    %cst_4 = arith.constant dense<0.000000e+00> : vector<16xf32>
    %10 = vector.multi_reduction <add>, %9, %cst_4 [1] : vector<16x256xf32> to vector<16xf32>
    %11 = vector.shape_cast %10 : vector<16xf32> to vector<16x1xf32>
    %cst_5 = arith.constant 2.560000e+02 : f32
    %12 = vector.broadcast %cst_5 : f32 to vector<16x1xf32>
    %13 = arith.divf %11, %12 : vector<16x1xf32>
    %cst_6 = arith.constant 9.99999974E-6 : f32
    %14 = vector.broadcast %cst_6 : f32 to vector<16x1xf32>
    %15 = arith.addf %13, %14 : vector<16x1xf32>
    %16 = math.rsqrt %15 : vector<16x1xf32>
    %c0_7 = arith.constant 0 : index
    %c0_8 = arith.constant 0 : index
    %17 = vector.load %arg3[%c0_7, %c0_8] : memref<1x256xf32, #tpu.memory_space<vmem>>, vector<1x256xf32>
    %18 = vector.broadcast %16 : vector<16x1xf32> to vector<16x256xf32>
    %19 = vector.broadcast %17 : vector<1x256xf32> to vector<16x256xf32>
    %20 = arith.mulf %18, %19 : vector<16x256xf32>
    %c0_9 = arith.constant 0 : index
    %c0_10 = arith.constant 0 : index
    %21 = vector.load %arg4[%c0_9, %c0_10] : memref<1x256xf32, #tpu.memory_space<vmem>>, vector<1x256xf32>
    %22 = vector.broadcast %6 : vector<16x1xf32> to vector<16x256xf32>
    %23 = arith.mulf %22, %20 : vector<16x256xf32>
    %24 = vector.broadcast %21 : vector<1x256xf32> to vector<16x256xf32>
    %25 = arith.subf %24, %23 : vector<16x256xf32>
    %26 = arith.mulf %2, %20 : vector<16x256xf32>
    %27 = arith.addf %26, %25 : vector<16x256xf32>
    %c0_11 = arith.constant 0 : index
    %c0_12 = arith.constant 0 : index
    %28 = vector.load %arg5[%c0_11, %c0_12] : memref<16x256xf32, #tpu.memory_space<vmem>>, vector<16x256xf32>
    tpu.vector_store %arg5[%c0_11, %c0_12], %27 {strides = array<i32>} : memref<16x256xf32, #tpu.memory_space<vmem>>, vector<16x256xf32>,
    return
  }
  func.func @transform_0(%arg0: i32) -> (i32, i32) {
    %c0_i32 = arith.constant 0 : i32
    %c0_i32_0 = arith.constant 0 : i32
    return %arg0, %c0_i32 : i32, i32
  }
  func.func @transform_1(%arg0: i32) -> (i32, i32) {
    %c0_i32 = arith.constant 0 : i32
    %c0_i32_0 = arith.constant 0 : i32
    return %arg0, %c0_i32 : i32, i32
  }
  func.func @transform_2(%arg0: i32) -> (i32, i32) {
    %c0_i32 = arith.constant 0 : i32
    %c0_i32_0 = arith.constant 0 : i32
    %c0_i32_1 = arith.constant 0 : i32
    return %c0_i32, %c0_i32_0 : i32, i32
  }
  func.func @transform_3(%arg0: i32) -> (i32, i32) {
    %c0_i32 = arith.constant 0 : i32
    %c0_i32_0 = arith.constant 0 : i32
    %c0_i32_1 = arith.constant 0 : i32
    return %c0_i32, %c0_i32_0 : i32, i32
  }
  func.func @transform_4(%arg0: i32) -> (i32, i32) {
    %c0_i32 = arith.constant 0 : i32
    %c0_i32_0 = arith.constant 0 : i32
    return %arg0, %c0_i32 : i32, i32
  }
}

</mosaic_0001>

<bundles_post_ra>
// kernel: tpu_custom_call.1
= control target key start
LH: loop header
LB: loop body
LE: loop exit
PB: predicated region body
PF: predicated region fallthrough
CT: control target
= control target key end

     0   :  { %9 = vsyncpa [#allocation3], 0  ;;  %s315_s0 = inlined_call_operand.hbm [shape: f32[16,256], index: 0, kind: input, shape index: {}]   ;;  %s316_s1 = inlined_call_operand.hbm [shape: f32[16,256], index: 1, kind: input, shape index: {}]   ;;  %s317_s2 = inlined_call_operand.vmem [shape: f32[1,256], index: 2, kind: input, shape index: {}]   ;;  %s318_s3 = inlined_call_operand.vmem [shape: f32[1,256], index: 3, kind: input, shape index: {}]   ;;  %s319_s4 = inlined_call_operand.hbm [shape: f32[16,256], index: 4, kind: output, shape index: {}]  }
   0x1   :  { %10 = vsyncpa [#allocation6], 0 }
   0x2   :  { %11 = vsyncpa [#allocation4], 0  ;;  %s234_s15 = smov [#allocation2]   ;;  %s162_s19 = scalar_lea.hbm %s315_s0, 512 }
   0x3   :  { %s17_s16 = sshll.u32 %s234_s15, 4  ;;  %p163_p0 = scmp.ne.s32.totalorder %s315_s0, %s162_s19  ;;  %s18_s16 = int_to_ptr.vmem [resolvable:$true] %s17_s16 }
   0x4   :  { %p166_p1 = scmp.lt.u32.totalorder %s162_s19, %s315_s0 }
   0x6   :  { %p168_p2 = pnand %p166_p1, %p163_p0 }
   0x8   :  { %171 = shalt.err (!%p168_p2)
}
   0x9   :  { %s172_s24 = scalar_lea.vmem %s18_s16, 512  ;;  %p177_p4 = scmp.lt.s32.totalorder %s18_s16, %s18_s16 }
   0xa   :  { %p173_p3 = scmp.ne.s32.totalorder %s18_s16, %s172_s24  ;;  %p178_p5 = scmp.lt.s32.totalorder %s172_s24, %s172_s24 }
   0xc   :  { %p179_p6 = por %p178_p5, %p177_p4 }
   0xe   :  { %p180_p7 = pnand %p179_p6, %p173_p3 }
  0x10   :  { %183 = shalt.err (!%p180_p7)
}
  0x11   :  { %s235_s25 = smov 256   ;;  %s236_s26 = smov 16  }
  0x12   :  { %23 = dma.hbm_to_vmem [thread:$0]  %s315_s0, 512, %s18_s16, [#allocation3], %s235_s25, %s235_s25, %s236_s26  }
  0x13   :  { %s237_s29 = smov [#allocation5]   ;;  %s184_s7 = scalar_lea.hbm %s316_s1, 512 }
  0x14   :  { %s29_s30 = sshll.u32 %s237_s29, 4  ;;  %p185_p8 = scmp.ne.s32.totalorder %s316_s1, %s184_s7  ;;  %s30_s30 = int_to_ptr.vmem [resolvable:$true] %s29_s30 }
  0x15   :  { %p188_p9 = scmp.lt.u32.totalorder %s184_s7, %s316_s1 }
  0x17   :  { %p190_p10 = pnand %p188_p9, %p185_p8 }
  0x19   :  { %193 = shalt.err (!%p190_p10)
}
  0x1a   :  { %s194_s12 = scalar_lea.vmem %s30_s30, 512  ;;  %p199_p12 = scmp.lt.s32.totalorder %s30_s30, %s30_s30 }
  0x1b   :  { %p195_p11 = scmp.ne.s32.totalorder %s30_s30, %s194_s12  ;;  %p200_p13 = scmp.lt.s32.totalorder %s194_s12, %s194_s12 }
  0x1d   :  { %p201_p0 = por %p200_p13, %p199_p12 }
  0x1f   :  { %p202_p1 = pnand %p201_p0, %p195_p11 }
  0x21   :  { %205 = shalt.err (!%p202_p1)
}
  0x22   :  { %35 = dma.hbm_to_vmem [thread:$0]  %s316_s1, 512, %s30_s30, [#allocation6], %s235_s25, %s235_s25, %s236_s26  }
  0x23   :  { %228 = dma.done.wait [#allocation3], 512  }
  0x24   :  { %229 = vsyncadd [#allocation3], 4294966784 }
  0x25   :  { %230 = dma.done.wait [#allocation6], 512  }
  0x26   :  { %231 = vsyncadd [#allocation6], 4294966784  ;;  %v46_v0 = vld [vmem:[#allocation2] sm:$0xff]  ;;  %v47_v1 = vld [vmem:[#allocation2 + $0x8] sm:$0xff]  ;;  %v89_v28 = vlaneseq }
  0x27   :  { %v50_v2 = vld [vmem:[#allocation5] sm:$0xff]  ;;  %v51_v3 = vld [vmem:[#allocation5 + $0x8] sm:$0xff]  ;;  %v48_v5 = vld [vmem:[#allocation2 + $0x10] sm:$0xff] }
  0x28   :  { %v54_v4 = vadd.f32 %v50_v2, %v46_v0  ;;  %v49_v6 = vld [vmem:[#allocation2 + $0x18] sm:$0xff]  ;;  %v55_v7 = vadd.f32 %v51_v3, %v47_v1  ;;  %v52_v8 = vld [vmem:[#allocation5 + $0x10] sm:$0xff]  ;;  %v90_v32 = vshrl.u32 %v89_v28, 7  ;;  %v87_v38 = vld [vmem:[%s317_s2] sm:$0x3]  ;;  %s238_s2 = smov [#allocation7]  }
  0x29   :  { %v53_v9 = vld [vmem:[#allocation5 + $0x18] sm:$0xff]  ;;  %v56_v10 = vadd.f32 %v52_v8, %v48_v5  ;;  %v103_v41 = vld [vmem:[%s318_s3] sm:$0x3]  ;;  %s140_s3 = sshll.u32 %s238_s2, 4  ;;  %s141_s3 = int_to_ptr.vmem [resolvable:$true] %s140_s3 }
  0x2a   :  { %v57_v11 = vadd.f32 %v53_v9, %v49_v6  ;;  %v58_v12 = vadd.f32 %v55_v7, %v54_v4  ;;  %v91_v36 = vsub.s32 0, %v90_v32  ;;  %v95_v37 = vsub.s32 1, %v90_v32  ;;  %s206_s17 = scalar_lea.vmem %s141_s3, 512  ;;  %p211_p3 = scmp.lt.s32.totalorder %s141_s3, %s141_s3 }
  0x2b   :  { %p207_p2 = scmp.ne.s32.totalorder %s141_s3, %s206_s17  ;;  %p212_p4 = scmp.lt.s32.totalorder %s206_s17, %s206_s17 }
  0x2c   :  { %59 = vadd.xlane.f32.xlu0 %v58_v12  ;;  %v61_v13 = vadd.f32 %v57_v11, %v56_v10  ;;  %v92_v39 = vrot.slane %v87_v38, %v91_v36  ;;  %v96_v40 = vrot.slane %v87_v38, %v95_v37  ;;  %v112_v45 = vrot.slane %v103_v41, %v91_v36 }
  0x2d   :  { %v116_v46 = vrot.slane %v103_v41, %v95_v37  ;;  %p213_p5 = por %p212_p4, %p211_p3 }
  0x2f   :  { %p214_p6 = pnand %p213_p5, %p207_p2 }
  0x30   :  { %62 = vadd.xlane.f32.xlu0 %v61_v13 }
  0xb9   :  { %v60_v14 = vpop.xlane.xlu0 %59 }
  0xba   :  { %v65_v15 = vmul.f32 0.00390625, %v60_v14 }
  0xbc   :  { %v67_v16 = vsub.f32 %v54_v4, %v65_v15  ;;  %v68_v17 = vsub.f32 %v55_v7, %v65_v15 }
  0xbd   :  { %v63_v18 = vpop.xlane.xlu0 %62 }
  0xbe   :  { %v66_v19 = vmul.f32 0.00390625, %v63_v18  ;;  %v71_v20 = vmul.f32 %v67_v16, %v67_v16  ;;  %v72_v21 = vmul.f32 %v68_v17, %v68_v17 }
  0xc0   :  { %v75_v22 = vadd.f32 %v72_v21, %v71_v20  ;;  %v69_v23 = vsub.f32 %v56_v10, %v66_v19  ;;  %v70_v24 = vsub.f32 %v57_v11, %v66_v19 }
  0xc2   :  { %76 = vadd.xlane.f32.xlu1 %v75_v22  ;;  %v73_v25 = vmul.f32 %v69_v23, %v69_v23  ;;  %v74_v26 = vmul.f32 %v70_v24, %v70_v24 }
  0xc4   :  { %v78_v27 = vadd.f32 %v74_v26, %v73_v25 }
  0xc6   :  { %79 = vadd.xlane.f32.xlu1 %v78_v27 }
 0x14f   :  { %v77_v29 = vpop.xlane.xlu1 %76 }
 0x150   :  { %v81_v30 = vmul.f32 0.00390625, %v77_v29 }
 0x152   :  { %v83_v31 = vadd.f32 1e-05, %v81_v30 }
 0x153   :  { %v80_v33 = vpop.xlane.xlu1 %79 }
 0x154   :  { %158 = vrsqrt.f32 %v83_v31  ;;  %v82_v34 = vmul.f32 0.00390625, %v80_v33 }
 0x156   :  { %v84_v35 = vadd.f32 1e-05, %v82_v34 }
 0x158   :  { %160 = vrsqrt.f32 %v84_v35 }
 0x15e   :  { %v159_v42 = vpop.eup %158 }
 0x15f   :  { %v99_v43 = vmul.f32 %v159_v42, %v92_v39  ;;  %v100_v44 = vmul.f32 %v159_v42, %v96_v40 }
 0x161   :  { %v104_v47 = vmul.f32 %v99_v43, %v65_v15  ;;  %v105_v48 = vmul.f32 %v100_v44, %v65_v15  ;;  %v123_v54 = vmul.f32 %v99_v43, %v54_v4  ;;  %v124_v55 = vmul.f32 %v100_v44, %v55_v7 }
 0x162   :  { %v161_v49 = vpop.eup %160 }
 0x163   :  { %v101_v50 = vmul.f32 %v161_v49, %v92_v39  ;;  %v102_v51 = vmul.f32 %v161_v49, %v96_v40  ;;  %v119_v52 = vsub.f32 %v112_v45, %v104_v47  ;;  %v120_v53 = vsub.f32 %v116_v46, %v105_v48 }
 0x165   :  { %v106_v56 = vmul.f32 %v101_v50, %v66_v19  ;;  %v107_v57 = vmul.f32 %v102_v51, %v66_v19  ;;  %v127_v58 = vadd.f32 %v123_v54, %v119_v52  ;;  %v128_v59 = vadd.f32 %v124_v55, %v120_v53 }
 0x166   :  { %v125_v62 = vmul.f32 %v101_v50, %v56_v10  ;;  %v126_v63 = vmul.f32 %v102_v51, %v57_v11 }
 0x167   :  { %v121_v60 = vsub.f32 %v112_v45, %v106_v56  ;;  %v122_v61 = vsub.f32 %v116_v46, %v107_v57  ;;  %131 = vst [vmem:[#allocation7] sm:$0xff] %v127_v58  ;;  %132 = vst [vmem:[#allocation7 + $0x8] sm:$0xff] %v128_v59 }
 0x169   :  { %v129_v0 = vadd.f32 %v125_v62, %v121_v60  ;;  %v130_v1 = vadd.f32 %v126_v63, %v122_v61 }
 0x16b   :  { %133 = vst [vmem:[#allocation7 + $0x10] sm:$0xff] %v129_v0  ;;  %134 = vst [vmem:[#allocation7 + $0x18] sm:$0xff] %v130_v1 }
 0x16c   :  { %217 = shalt.err (!%p214_p6)
}
 0x16d   :  { %s218_s20 = scalar_lea.hbm %s319_s4, 512 }
 0x16e   :  { %p219_p7 = scmp.ne.s32.totalorder %s319_s4, %s218_s20  ;;  %p222_p8 = scmp.lt.u32.totalorder %s218_s20, %s319_s4 }
 0x170   :  { %p224_p9 = pnand %p222_p8, %p219_p7 }
 0x172   :  { %227 = shalt.err (!%p224_p9)
}
 0x173   :  { %146 = dma.vmem_to_hbm [thread:$0]  %s141_s3, 512, %s319_s4, [#allocation4], %s235_s25, %s235_s25, %s236_s26  }
 0x174   :  { %232 = dma.done.wait [#allocation4], 512  }
 0x175   :  { %233 = vsyncadd [#allocation4], 4294966784 }
 0x176   :  { %150 = vsyncpa [#allocation3], 1 }
 0x177   :  { %151 = vsyncpa [#allocation6], 1 }
 0x178   :  { %152 = vsyncpa [#allocation4], 1 }

</bundles_post_ra>
